<compile_context>
chip_gen: v6e
topology: v6e:2x2x1
jax: 0.10.0
libtpu: 0.0.40
codegen_flags: <defaults>
</compile_context>

<pallas_src>
import functools

import jax
import jax.numpy as jnp
from jax.experimental import pallas as pl
from jax.experimental.pallas import tpu as pltpu

# Fixed class weights hard-coded in the PyTorch module's forward().
CLASS_WEIGHTS = (0.01988008, 4.06510283, 0.01988008, 0.38680778, 0.04662644, 0.48158286)
NUM_CLASSES = 6


def _im_ce_kernel(logits_ref, labels_ref, out_ref, acc_ref, *, n_samples):
    pid = pl.program_id(0)

    @pl.when(pid == 0)
    def _init():
        acc_ref[...] = jnp.zeros_like(acc_ref)

    x = logits_ref[...].astype(jnp.float32)       # [C, TN]  (f32 math: safe on v5e too)
    lab = labels_ref[...]                         # [1, TN]  int32

    # ---- max over the 6 class rows (unrolled, VPU) ----
    m = x[0:1, :]
    for c in range(1, NUM_CLASSES):
        m = jnp.maximum(m, x[c:c + 1, :])

    # ---- log-sum-exp over the 6 class rows (exp/log go to EUP) ----
    s = jnp.exp(x[0:1, :] - m)
    for c in range(1, NUM_CLASSES):
        s = s + jnp.exp(x[c:c + 1, :] - m)
    lse = m + jnp.log(s)                          # [1, TN]

    # ---- gather logit at the label + per-sample class weight via selects ----
    # (jnp.where instead of one_hot * logits: avoids 0 * -inf -> NaN)
    picked = jnp.zeros_like(m)
    w = jnp.zeros_like(m)
    for c in range(NUM_CLASSES):
        eq = lab == c                              # never true for pad label -1
        picked = jnp.where(eq, x[c:c + 1, :], picked)
        w = jnp.where(eq, jnp.float32(CLASS_WEIGHTS[c]), w)

    ce = lse - picked                              # [1, TN]
    acc_ref[...] += ce * w                         # padded columns contribute 0

    @pl.when(pid == pl.num_programs(0) - 1)
    def _finalize():
        total = jnp.sum(acc_ref[...])              # single cross-lane reduce
        out_ref[...] = jnp.reshape(total / jnp.float32(n_samples), (1, 1))


def im_cross_entropy_loss(cls_score, label, loss_weight=1.0, tile_n=512):
    """cls_score: [N, C] float logits (any float dtype), label: [N] int in [0, C)."""
    n, c = cls_score.shape
    assert c == NUM_CLASSES, "module hard-codes 6 classes"

    # Lane-dense layout: classes along sublanes, samples along lanes.
    logits_t = jnp.transpose(cls_score)                    # [C, N], native dtype
    labels2d = label.astype(jnp.int32).reshape(1, n)       # [1, N]

    n_blocks = pl.cdiv(n, tile_n)
    n_pad = n_blocks * tile_n
    if n_pad != n:
        logits_t = jnp.pad(logits_t, ((0, 0), (0, n_pad - n)))
        labels2d = jnp.pad(labels2d, ((0, 0), (0, n_pad - n)), constant_values=-1)

    kernel = functools.partial(_im_ce_kernel, n_samples=n)

    out = pl.pallas_call(
        kernel,
        out_shape=jax.ShapeDtypeStruct((1, 1), jnp.float32),
        grid_spec=pltpu.PrefetchScalarGridSpec(
            num_scalar_prefetch=0,
            grid=(n_blocks,),
            in_specs=[
                pl.BlockSpec((NUM_CLASSES, tile_n), lambda i: (0, i)),
                pl.BlockSpec((1, tile_n), lambda i: (0, i)),
            ],
            out_specs=pl.BlockSpec((1, 1), lambda i: (0, 0)),
            scratch_shapes=[pltpu.VMEM((1, tile_n), jnp.float32)],
        ),
        compiler_params=pltpu.CompilerParams(
            dimension_semantics=("arbitrary",),   # accumulator resident across the axis
        ),
    )(logits_t, labels2d)

    return loss_weight * out[0, 0]


def _reference(cls_score, label, loss_weight=1.0):
    cw = jnp.asarray(CLASS_WEIGHTS, dtype=jnp.float32)
    logp = jax.nn.log_softmax(cls_score.astype(jnp.float32), axis=-1)
    ce = -jnp.take_along_axis(logp, label[:, None].astype(jnp.int32), axis=-1)[:, 0]
    w = cw[label]
    return loss_weight * jnp.mean(ce * w)


if __name__ == "__main__":
    key = jax.random.PRNGKey(0)

    # Case 1: multi-tile with a ragged tail (exercises padding + accumulator).
    k1, k2 = jax.random.split(key)
    N1 = 700
    logits1 = jax.random.normal(k1, (N1, NUM_CLASSES), dtype=jnp.float32)
    labels1 = jax.random.randint(k2, (N1,), 0, NUM_CLASSES, dtype=jnp.int32)
    loss1 = jax.block_until_ready(im_cross_entropy_loss(logits1, labels1, tile_n=256))
    ref1 = _reference(logits1, labels1)
    assert jnp.allclose(loss1, ref1, rtol=1e-5, atol=1e-6), (loss1, ref1)

    # Case 2: tiny batch, single tile.
    k3, k4 = jax.random.split(k1)
    N2 = 8
    logits2 = jax.random.normal(k3, (N2, NUM_CLASSES), dtype=jnp.float32)
    labels2 = jax.random.randint(k4, (N2,), 0, NUM_CLASSES, dtype=jnp.int32)
    loss2 = jax.block_until_ready(im_cross_entropy_loss(logits2, labels2, loss_weight=1.0))
    ref2 = _reference(logits2, labels2, loss_weight=1.0)
    assert jnp.allclose(loss2, ref2, rtol=1e-5, atol=1e-6), (loss2, ref2)

    print("KERNEL_OK")
</pallas_src>

<mosaic_0001>
module attributes {stable_mosaic.version = 11 : i64} {
  func.func @_im_ce_kernel(%arg0: i32, %arg1: memref<6x256xf32, #tpu.memory_space<vmem>>, %arg2: memref<1x256xi32, #tpu.memory_space<vmem>>, %arg3: memref<1x1xf32, #tpu.memory_space<vmem>>, %arg4: memref<1x256xf32, #tpu.memory_space<vmem>>) attributes {dimension_semantics = [#tpu.dimension_semantics<arbitrary>], iteration_bounds = array<i64: 3>, scalar_prefetch = 0 : i64, scratch_operands = 1 : i64, tpu.core_type = #tpu.core_type<tc>, window_params = [{transform_indices = @transform_0, window_bounds = array<i64: 6, 256>}, {transform_indices = @transform_1, window_bounds = array<i64: 1, 256>}, {pipeline_mode = #tpu.pipeline_mode<synchronous>, transform_indices = @transform_2, window_bounds = array<i64: 1, 1>}]} {
    %c0_i32 = arith.constant 0 : i32
    %0 = arith.cmpi eq, %arg0, %c0_i32 : i32
    %1 = arith.extui %0 : i1 to i32
    %c0_i32_0 = arith.constant 0 : i32
    %2 = arith.cmpi ne, %1, %c0_i32_0 : i32
    scf.if %2 {
      %cst_18 = arith.constant 0.000000e+00 : f32
      %87 = vector.broadcast %cst_18 : f32 to vector<1x256xf32>
      %c0_19 = arith.constant 0 : index
      %c0_20 = arith.constant 0 : index
      %88 = vector.load %arg4[%c0_19, %c0_20] : memref<1x256xf32, #tpu.memory_space<vmem>>, vector<1x256xf32>
      tpu.vector_store %arg4[%c0_19, %c0_20], %87 {strides = array<i32>} : memref<1x256xf32, #tpu.memory_space<vmem>>, vector<1x256xf32>,
    } else {
    }
    %c0 = arith.constant 0 : index
    %c0_1 = arith.constant 0 : index
    %3 = vector.load %arg1[%c0, %c0_1] : memref<6x256xf32, #tpu.memory_space<vmem>>, vector<6x256xf32>
    %c0_2 = arith.constant 0 : index
    %c0_3 = arith.constant 0 : index
    %4 = vector.load %arg2[%c0_2, %c0_3] : memref<1x256xi32, #tpu.memory_space<vmem>>, vector<1x256xi32>
    %5 = vector.extract_strided_slice %3 {offsets = [0, 0], sizes = [1, 256], strides = [1, 1]} : vector<6x256xf32> to vector<1x256xf32>
    %6 = vector.extract_strided_slice %3 {offsets = [1, 0], sizes = [1, 256], strides = [1, 1]} : vector<6x256xf32> to vector<1x256xf32>
    %7 = arith.maximumf %5, %6 : vector<1x256xf32>
    %8 = vector.extract_strided_slice %3 {offsets = [2, 0], sizes = [1, 256], strides = [1, 1]} : vector<6x256xf32> to vector<1x256xf32>
    %9 = arith.maximumf %7, %8 : vector<1x256xf32>
    %10 = vector.extract_strided_slice %3 {offsets = [3, 0], sizes = [1, 256], strides = [1, 1]} : vector<6x256xf32> to vector<1x256xf32>
    %11 = arith.maximumf %9, %10 : vector<1x256xf32>
    %12 = vector.extract_strided_slice %3 {offsets = [4, 0], sizes = [1, 256], strides = [1, 1]} : vector<6x256xf32> to vector<1x256xf32>
    %13 = arith.maximumf %11, %12 : vector<1x256xf32>
    %14 = vector.extract_strided_slice %3 {offsets = [5, 0], sizes = [1, 256], strides = [1, 1]} : vector<6x256xf32> to vector<1x256xf32>
    %15 = arith.maximumf %13, %14 : vector<1x256xf32>
    %16 = vector.extract_strided_slice %3 {offsets = [0, 0], sizes = [1, 256], strides = [1, 1]} : vector<6x256xf32> to vector<1x256xf32>
    %17 = arith.subf %16, %15 : vector<1x256xf32>
    %18 = math.exp %17 : vector<1x256xf32>
    %19 = vector.extract_strided_slice %3 {offsets = [1, 0], sizes = [1, 256], strides = [1, 1]} : vector<6x256xf32> to vector<1x256xf32>
    %20 = arith.subf %19, %15 : vector<1x256xf32>
    %21 = math.exp %20 : vector<1x256xf32>
    %22 = arith.addf %18, %21 : vector<1x256xf32>
    %23 = vector.extract_strided_slice %3 {offsets = [2, 0], sizes = [1, 256], strides = [1, 1]} : vector<6x256xf32> to vector<1x256xf32>
    %24 = arith.subf %23, %15 : vector<1x256xf32>
    %25 = math.exp %24 : vector<1x256xf32>
    %26 = arith.addf %22, %25 : vector<1x256xf32>
    %27 = vector.extract_strided_slice %3 {offsets = [3, 0], sizes = [1, 256], strides = [1, 1]} : vector<6x256xf32> to vector<1x256xf32>
    %28 = arith.subf %27, %15 : vector<1x256xf32>
    %29 = math.exp %28 : vector<1x256xf32>
    %30 = arith.addf %26, %29 : vector<1x256xf32>
    %31 = vector.extract_strided_slice %3 {offsets = [4, 0], sizes = [1, 256], strides = [1, 1]} : vector<6x256xf32> to vector<1x256xf32>
    %32 = arith.subf %31, %15 : vector<1x256xf32>
    %33 = math.exp %32 : vector<1x256xf32>
    %34 = arith.addf %30, %33 : vector<1x256xf32>
    %35 = vector.extract_strided_slice %3 {offsets = [5, 0], sizes = [1, 256], strides = [1, 1]} : vector<6x256xf32> to vector<1x256xf32>
    %36 = arith.subf %35, %15 : vector<1x256xf32>
    %37 = math.exp %36 : vector<1x256xf32>
    %38 = arith.addf %34, %37 : vector<1x256xf32>
    %39 = math.log %38 : vector<1x256xf32>
    %40 = arith.addf %15, %39 : vector<1x256xf32>
    %cst = arith.constant 0.000000e+00 : f32
    %41 = vector.broadcast %cst : f32 to vector<1x256xf32>
    %cst_4 = arith.constant 0.000000e+00 : f32
    %42 = vector.broadcast %cst_4 : f32 to vector<1x256xf32>
    %c0_i32_5 = arith.constant 0 : i32
    %43 = vector.broadcast %c0_i32_5 : i32 to vector<1x256xi32>
    %44 = arith.cmpi eq, %4, %43 : vector<1x256xi32>
    %45 = vector.extract_strided_slice %3 {offsets = [0, 0], sizes = [1, 256], strides = [1, 1]} : vector<6x256xf32> to vector<1x256xf32>
    %46 = arith.select %44, %45, %41 : vector<1x256xi1>, vector<1x256xf32>
    %cst_6 = arith.constant 0.0198800806 : f32
    %47 = vector.broadcast %cst_6 : f32 to vector<1x256xf32>
    %48 = arith.select %44, %47, %42 : vector<1x256xi1>, vector<1x256xf32>
    %c1_i32 = arith.constant 1 : i32
    %49 = vector.broadcast %c1_i32 : i32 to vector<1x256xi32>
    %50 = arith.cmpi eq, %4, %49 : vector<1x256xi32>
    %51 = vector.extract_strided_slice %3 {offsets = [1, 0], sizes = [1, 256], strides = [1, 1]} : vector<6x256xf32> to vector<1x256xf32>
    %52 = arith.select %50, %51, %46 : vector<1x256xi1>, vector<1x256xf32>
    %cst_7 = arith.constant 4.06510305 : f32
    %53 = vector.broadcast %cst_7 : f32 to vector<1x256xf32>
    %54 = arith.select %50, %53, %48 : vector<1x256xi1>, vector<1x256xf32>
    %c2_i32 = arith.constant 2 : i32
    %55 = vector.broadcast %c2_i32 : i32 to vector<1x256xi32>
    %56 = arith.cmpi eq, %4, %55 : vector<1x256xi32>
    %57 = vector.extract_strided_slice %3 {offsets = [2, 0], sizes = [1, 256], strides = [1, 1]} : vector<6x256xf32> to vector<1x256xf32>
    %58 = arith.select %56, %57, %52 : vector<1x256xi1>, vector<1x256xf32>
    %cst_8 = arith.constant 0.0198800806 : f32
    %59 = vector.broadcast %cst_8 : f32 to vector<1x256xf32>
    %60 = arith.select %56, %59, %54 : vector<1x256xi1>, vector<1x256xf32>
    %c3_i32 = arith.constant 3 : i32
    %61 = vector.broadcast %c3_i32 : i32 to vector<1x256xi32>
    %62 = arith.cmpi eq, %4, %61 : vector<1x256xi32>
    %63 = vector.extract_strided_slice %3 {offsets = [3, 0], sizes = [1, 256], strides = [1, 1]} : vector<6x256xf32> to vector<1x256xf32>
    %64 = arith.select %62, %63, %58 : vector<1x256xi1>, vector<1x256xf32>
    %cst_9 = arith.constant 0.38680777 : f32
    %65 = vector.broadcast %cst_9 : f32 to vector<1x256xf32>
    %66 = arith.select %62, %65, %60 : vector<1x256xi1>, vector<1x256xf32>
    %c4_i32 = arith.constant 4 : i32
    %67 = vector.broadcast %c4_i32 : i32 to vector<1x256xi32>
    %68 = arith.cmpi eq, %4, %67 : vector<1x256xi32>
    %69 = vector.extract_strided_slice %3 {offsets = [4, 0], sizes = [1, 256], strides = [1, 1]} : vector<6x256xf32> to vector<1x256xf32>
    %70 = arith.select %68, %69, %64 : vector<1x256xi1>, vector<1x256xf32>
    %cst_10 = arith.constant 0.0466264412 : f32
    %71 = vector.broadcast %cst_10 : f32 to vector<1x256xf32>
    %72 = arith.select %68, %71, %66 : vector<1x256xi1>, vector<1x256xf32>
    %c5_i32 = arith.constant 5 : i32
    %73 = vector.broadcast %c5_i32 : i32 to vector<1x256xi32>
    %74 = arith.cmpi eq, %4, %73 : vector<1x256xi32>
    %75 = vector.extract_strided_slice %3 {offsets = [5, 0], sizes = [1, 256], strides = [1, 1]} : vector<6x256xf32> to vector<1x256xf32>
    %76 = arith.select %74, %75, %70 : vector<1x256xi1>, vector<1x256xf32>
    %cst_11 = arith.constant 0.48158285 : f32
    %77 = vector.broadcast %cst_11 : f32 to vector<1x256xf32>
    %78 = arith.select %74, %77, %72 : vector<1x256xi1>, vector<1x256xf32>
    %79 = arith.subf %40, %76 : vector<1x256xf32>
    %c0_12 = arith.constant 0 : index
    %c0_13 = arith.constant 0 : index
    %80 = vector.load %arg4[%c0_12, %c0_13] : memref<1x256xf32, #tpu.memory_space<vmem>>, vector<1x256xf32>
    %81 = arith.mulf %79, %78 : vector<1x256xf32>
    %82 = arith.addf %80, %81 : vector<1x256xf32>
    %c0_14 = arith.constant 0 : index
    %c0_15 = arith.constant 0 : index
    %83 = vector.load %arg4[%c0_14, %c0_15] : memref<1x256xf32, #tpu.memory_space<vmem>>, vector<1x256xf32>
    tpu.vector_store %arg4[%c0_14, %c0_15], %82 {strides = array<i32>} : memref<1x256xf32, #tpu.memory_space<vmem>>, vector<1x256xf32>,
    %c2_i32_16 = arith.constant 2 : i32
    %84 = arith.cmpi eq, %arg0, %c2_i32_16 : i32
    %85 = arith.extui %84 : i1 to i32
    %c0_i32_17 = arith.constant 0 : i32
    %86 = arith.cmpi ne, %85, %c0_i32_17 : i32
    scf.if %86 {
      %c0_18 = arith.constant 0 : index
      %c0_19 = arith.constant 0 : index
      %87 = vector.load %arg4[%c0_18, %c0_19] : memref<1x256xf32, #tpu.memory_space<vmem>>, vector<1x256xf32>
      %88 = vector.shape_cast %87 : vector<1x256xf32> to vector<1x1x256xf32>
      %cst_20 = arith.constant dense<0.000000e+00> : vector<1xf32>
      %89 = vector.multi_reduction <add>, %88, %cst_20 [1, 2] : vector<1x1x256xf32> to vector<1xf32>
      %90 = vector.shape_cast %89 : vector<1xf32> to vector<1x1x1xf32>
      %91 = vector.extract %90[0, 0, 0] : f32 from vector<1x1x1xf32>
      %cst_21 = arith.constant 7.000000e+02 : f32
      %92 = arith.divf %91, %cst_21 : f32
      %93 = vector.broadcast %92 : f32 to vector<1x1xf32>
      %c0_22 = arith.constant 0 : index
      %c0_23 = arith.constant 0 : index
      %94 = vector.load %arg3[%c0_22, %c0_23] : memref<1x1xf32, #tpu.memory_space<vmem>>, vector<1x1xf32>
      tpu.vector_store %arg3[%c0_22, %c0_23], %93 {strides = array<i32>} : memref<1x1xf32, #tpu.memory_space<vmem>>, vector<1x1xf32>,
    } else {
    }
    return
  }
  func.func @transform_0(%arg0: i32) -> (i32, i32) {
    %c0_i32 = arith.constant 0 : i32
    %c0_i32_0 = arith.constant 0 : i32
    return %c0_i32, %arg0 : i32, i32
  }
  func.func @transform_1(%arg0: i32) -> (i32, i32) {
    %c0_i32 = arith.constant 0 : i32
    %c0_i32_0 = arith.constant 0 : i32
    return %c0_i32, %arg0 : i32, i32
  }
  func.func @transform_2(%arg0: i32) -> (i32, i32) {
    %c0_i32 = arith.constant 0 : i32
    %c0_i32_0 = arith.constant 0 : i32
    %c0_i32_1 = arith.constant 0 : i32
    return %c0_i32, %c0_i32_0 : i32, i32
  }
}

</mosaic_0001>

<bundles_post_ra>
// kernel: tpu_custom_call.1
= control target key start
LH: loop header
LB: loop body
LE: loop exit
PB: predicated region body
PF: predicated region fallthrough
CT: control target
= control target key end

     0   :  { %7 = vsyncpa [#allocation4], 0  ;;  %s1052_s0 = inlined_call_operand.hbm [shape: f32[6,768], index: 0, kind: input, shape index: {}]   ;;  %s1053_s1 = inlined_call_operand.hbm [shape: s32[1,768], index: 1, kind: input, shape index: {}]   ;;  %s1054_s2 = inlined_call_operand.hbm [shape: f32[1,1], index: 2, kind: output, shape index: {}]  }
   0x1   :  { %9 = vsyncpa [#allocation4 + $0x1], 0 }
   0x2   :  { %10 = vsyncpa [#allocation7], 0 }
   0x3   :  { %12 = vsyncpa [#allocation7 + $0x1], 0 }
   0x4   :  { %13 = vsyncpa [#allocation5], 0  ;;  %s825_s9 = smov 0   ;;  %s827_s10 = smov 0  }
   0x5   :  { %s829_s11 = smov 0   ;;  %s831_s12 = smov 0  }
   0x6 LB: > { %s844_s13 = sadd.s32 4294967295, %s802_s12   ;;  %s847_s14 = sadd.s32 1, %s802_s12   ;;  %s802_s12 = sphi %s831_s12, %s1066_s12   ;;  %s798_s11 = sphi %s829_s11, %s1065_s11   ;;  %s794_s10 = sphi %s827_s10, %s1064_s10   ;;  %s790_s9 = sphi %s825_s9, %s1063_s9  }
   0x7   : > { %s23_s15 = ssub.s32 %s802_s12, %s847_s14  ;;  %s26_s16 = sadd.s32 1, %s798_s11 }
   0x8   : > { %p24_p0 = scmp.eq.s32.totalorder %s23_s15, 0  ;;  %p33_p1 = scmp.ne.s32.totalorder %s798_s11, %s794_s10 }
   0x9   : > { %p34_p2 = scmp.eq.s32.totalorder %s802_s12, 0  ;;  %p39_p3 = scmp.ne.s32.totalorder %s794_s10, %s790_s9 }
   0xa   : > { %s857_s17 = scalar_select %p24_p0, %s798_s11, %s26_s16  }
   0xb   : > { %p35_p4 = por %p34_p2, %p33_p1  ;;  %p40_p5 = scmp.eq.s32.totalorder %s844_s13, 0 }
   0xc   : > { %p611_p6 = scmp.lt.s32.totalorder %s802_s12, 3  ;;  %s866_s19 = sand.u32 1, %s798_s11  }
   0xd   : > { %p861_p7 = por %p40_p5, %p39_p3  ;;  %s577_s20 = sshll.u32 %s866_s19, 4 }
   0xe   : > { %s592_s21 = sshll.u32 %s802_s12, 8  ;;  %s114_s25 = scalar_lea.vmem [#allocation3], %s577_s20 }
   0xf   : > { %s1056_s18 = scalar_select %p861_p7, 1, 0 }
  0x10   : > { %s873_s24 = scalar_lea.hbm %s1052_s0, %s592_s21  ;;  %s122_s26 = sshll.u32 %s114_s25, 4  ;;  %s875_s26 = int_to_ptr.vmem [resolvable:$true] %s122_s26 }
  0x11   : > { %p877_p8 = pnand %p611_p6, %p35_p4  ;;  %s111_s28 = scalar_lea.sflag [#allocation4], %s866_s19 }
  0x12   : > { %s680_s29 = scalar_lea.hbm %s873_s24, 256  ;;  %s685_s4 = scalar_lea.hbm %s1052_s0, 768 }
  0x13   : > { %p681_p11 = scmp.ne.s32.totalorder %s873_s24, %s680_s29  ;;  %p682_p12 = pneg %p877_p8 }
  0x14   : > { %p686_p1 = scmp.lt.s32.totalorder %s873_s24, %s1052_s0  ;;  %p687_p2 = scmp.lt.s32.totalorder %s685_s4, %s680_s29 }
  0x15   : > { %p683_p13 = pnand %p682_p12, %p681_p11 }
  0x16   : > { %p688_p3 = por %p687_p2, %p686_p1 }
  0x17   : > { %p684_p0 = pneg %p683_p13 }
  0x19   : > { %p689_p4 = pnand %p688_p3, %p684_p0 }
  0x1b   : > { %692 = shalt.err (!%p689_p4)
}
  0x1c   : > { %s693_s7 = scalar_lea.vmem %s875_s26, 256  ;;  %s804_s8 = smov [#allocation3]  }
  0x1d   : > { %p694_p5 = scmp.ne.s32.totalorder %s875_s26, %s693_s7  ;;  %s698_s9 = sshll.u32 %s804_s8, 4  ;;  %s699_s9 = int_to_ptr.vmem [resolvable:$false] %s698_s9 }
  0x1e   : > { %s700_s15 = scalar_lea.vmem %s699_s9, 512  ;;  %p701_p13 = scmp.lt.s32.totalorder %s875_s26, %s699_s9 }
  0x1f   : > { %p696_p6 = pnand %p694_p5, %p682_p12  ;;  %p702_p9 = scmp.lt.s32.totalorder %s700_s15, %s693_s7 }
  0x21   : > { %p697_p11 = pneg %p696_p6  ;;  %p703_p10 = por %p702_p9, %p701_p13 }
  0x23   : > { %p704_p1 = pnand %p703_p10, %p697_p11 }
  0x25   : > { %707 = shalt.err (!%p704_p1)
}
  0x26   : > { %607 = dma.hbm_to_vmem [thread:$0]  (!%p877_p8), %s873_s24, 256, %s875_s26, %s111_s28  }
  0x27   : > { %p1058_p0 = scmp.lt.s32.totalorder %s802_s12, 4  ;;  %p1059_p2 = scmp.ge.s32.totalorder %s802_s12, 1 }
  0x28   : > { %s580_s20 = sshll.u32 %s866_s19, 1  ;;  %s593_s21 = sshll.u32 %s802_s12, 5 }
  0x29   : > { %p912_p3 = pnand %p1059_p2, %p1058_p0  ;;  %s921_s25 = scalar_lea.hbm %s1053_s1, %s593_s21 }
  0x2a   : > { %s133_s29 = scalar_lea.vmem [#allocation6], %s580_s20  ;;  %s130_s24 = scalar_lea.sflag [#allocation7], %s866_s19 }
  0x2b   : > { %s1060_s16 = scalar_select %p912_p3, 1, 0 }
  0x2c   : > { %s141_s30 = sshll.u32 %s133_s29, 4  ;;  %s708_s26 = scalar_lea.hbm %s921_s25, 32  ;;  %s142_s30 = int_to_ptr.vmem [resolvable:$true] %s141_s30 }
  0x2d   : > { %p709_p9 = scmp.ne.s32.totalorder %s921_s25, %s708_s26  ;;  %s713_s3 = scalar_lea.hbm %s1053_s1, 96 }
  0x2e   : > { %p714_p5 = scmp.lt.s32.totalorder %s921_s25, %s1053_s1  ;;  %p715_p6 = scmp.lt.s32.totalorder %s713_s3, %s708_s26 }
  0x2f   : > { %p711_p10 = pnand %p709_p9, %p682_p12 }
  0x30   : > { %p716_p11 = por %p715_p6, %p714_p5 }
  0x31   : > { %p712_p4 = pneg %p711_p10 }
  0x33   : > { %p717_p13 = pnand %p716_p11, %p712_p4 }
  0x35   : > { %720 = shalt.err (!%p717_p13)
}
  0x36   : > { %s721_s6 = scalar_lea.vmem %s142_s30, 32  ;;  %s805_s19 = smov [#allocation6]  }
  0x37   : > { %p722_p1 = scmp.ne.s32.totalorder %s142_s30, %s721_s6  ;;  %s726_s7 = sshll.u32 %s805_s19, 4  ;;  %s727_s7 = int_to_ptr.vmem [resolvable:$false] %s726_s7 }
  0x38   : > { %s728_s8 = scalar_lea.vmem %s727_s7, 64  ;;  %p729_p9 = scmp.lt.s32.totalorder %s142_s30, %s727_s7 }
  0x39   : > { %p724_p0 = pnand %p722_p1, %p682_p12  ;;  %p730_p10 = scmp.lt.s32.totalorder %s728_s8, %s721_s6 }
  0x3b   : > { %p725_p2 = pneg %p724_p0  ;;  %p731_p7 = por %p730_p10, %p729_p9 }
  0x3d   : > { %p732_p3 = pnand %p731_p7, %p725_p2 }
  0x3f   : > { %735 = shalt.err (!%p732_p3)
}
  0x40   : > { %610 = dma.hbm_to_vmem [thread:$0]  (!%p877_p8), %s921_s25, 32, %s142_s30, %s130_s24  }
  0x41   : > { %p1061_p4 = scmp.ne.s32.totalorder %s1060_s16, 0 }
  0x42   : > { %s152_s9 = sand.u32 (!%p1061_p4), 1, %s794_s10   ;;  %p1062_p12 = scmp.ne.s32.totalorder (!%p1061_p4), %s1056_s18, 0 }
  0x43   : > { %150 = sbr.rel (%p1061_p4) target bundleno = 395 (0x18b), region = 28  ;;  %s584_s15 = sshll.u32 (!%p1061_p4), %s152_s9, 4 }
  0x44   : > { %s153_s20 = scalar_lea.sflag (!%p1061_p4), [#allocation4], %s152_s9  ;;  %s156_s21 = scalar_lea.vmem (!%p1061_p4), [#allocation3], %s584_s15 }
  0x48   : > { %777 = dma.done.wait (%p1062_p12), %s153_s20, 256  }
  0x49   : > { %779 = vsyncadd (%p1062_p12), %s153_s20, 4294967040  ;;  %s585_s22 = sshll.u32 %s152_s9, 1  ;;  %s162_s23 = scalar_lea.sflag [#allocation7], %s152_s9 }
  0x4a   : > { %s949_s27 = scalar_lea.vmem [#allocation6], %s585_s22 }
  0x4b   : > { %781 = dma.done.wait (%p1062_p12), %s162_s23, 32  }
  0x4c   : > { %783 = vsyncadd (%p1062_p12), %s162_s23, 4294967264  ;;  %p586_p7 = scmp.ne.s32.totalorder %s844_s13, 0 }
  0x4e   : > { %191 = sbr.rel (%p586_p7) target bundleno = 87 (0x57), region = 40 }
  0x53   : > { %v192_v0 = vlaneseq  ;;  %v806_v1 = vmov 0.0  }
  0x55   : > { %vm194_vm0 = vcmp.lt.s32.totalorder %v192_v0, 256 }
  0x56   : > { %196 = vst.msk [vmem:[#allocation2] sm:$0x3] %vm194_vm0, %v806_v1 }
  0x57 PF: > { %v956_v2 = vld [vmem:[%s156_s21] sm:$0x3f]  ;;  %v958_v3 = vld [vmem:[%s156_s21 + $0x8] sm:$0x3f]  ;;  %v341_v24 = vlaneseq  ;;  %v807_v46 = vmov 1966171168  }
  0x58   : > { %v202_v4 = vrot.slane %v956_v2, 1  ;;  %v203_v5 = vrot.slane %v958_v3, 1  ;;  %v208_v6 = vrot.slane %v956_v2, 2  ;;  %v209_v7 = vrot.slane %v958_v3, 2  ;;  %p587_p8 = scmp.ne.s32.totalorder %s844_s13, 2 }
  0x59   : > { %v214_v10 = vrot.slane %v956_v2, 3  ;;  %v215_v11 = vrot.slane %v958_v3, 3  ;;  %v220_v14 = vrot.slane %v956_v2, 4  ;;  %v221_v15 = vrot.slane %v958_v3, 4 }
  0x5a   : > { %v206_v8 = vmax.f32 %v956_v2, %v202_v4  ;;  %v207_v9 = vmax.f32 %v958_v3, %v203_v5  ;;  %v226_v18 = vrot.slane %v956_v2, 5  ;;  %v227_v19 = vrot.slane %v958_v3, 5 }
  0x5b   : > { %v339_v47 = vunpack.c.l.s4 %v807_v46  ;;  %v1001_v59 = vshrl.u32 %v341_v24, 7  ;;  %v337_v63 = vcombine.low %v956_v2, %v958_v3  ;;  %vm456_vm7 = vcmp.lt.s32.totalorder %v341_v24, 256 }
  0x5c   : > { %v212_v12 = vmax.f32 %v206_v8, %v208_v6  ;;  %v213_v13 = vmax.f32 %v207_v9, %v209_v7 }
  0x5d   : > { %v340_v62 = vunpack.c.0.s8 %v339_v47 }
  0x5e   : > { %v218_v16 = vmax.f32 %v212_v12, %v214_v10  ;;  %v219_v17 = vmax.f32 %v213_v13, %v215_v11  ;;  %v199_v12 = vld [vmem:[%s949_s27] sm:$0x3] }
  0x5f   : > { %v1006_v0 = vsub.s32 %v340_v62, %v1001_v59  ;;  %vm336_vm1 = vcmp.eq.s32.totalorder %v199_v12, 0  ;;  %vm355_vm2 = vcmp.eq.s32.totalorder %v199_v12, 1  ;;  %vm367_vm3 = vcmp.eq.s32.totalorder %v199_v12, 2 }
  0x60   : > { %v224_v20 = vmax.f32 %v218_v16, %v220_v14  ;;  %v225_v21 = vmax.f32 %v219_v17, %v221_v15  ;;  %vm372_vm4 = vcmp.eq.s32.totalorder %v199_v12, 3  ;;  %vm377_vm5 = vcmp.eq.s32.totalorder %v199_v12, 4 }
  0x61   : > { %v344_v6 = vrot.slane %v337_v63, %v1006_v0  ;;  %vm396_vm6 = vcmp.eq.s32.totalorder %v199_v12, 5  ;;  %v415_v62 = vsub.s32 1, %v1001_v59 }
  0x62   : > { %v972_v22 = vmax.f32 %v224_v20, %v226_v18  ;;  %v974_v23 = vmax.f32 %v225_v21, %v227_v19 }
  0x63   : > { %v356_v18 = vcombine.high %v344_v6, %v344_v6 }
  0x64   : > { %v232_v25 = vsub.f32 %v956_v2, %v972_v22  ;;  %v233_v26 = vsub.f32 %v958_v3, %v974_v23  ;;  %v240_v27 = vrot.slane %v972_v22, 7  ;;  %v241_v28 = vrot.slane %v974_v23, 7 }
  0x65   : > { %v258_v29 = vrot.slane %v972_v22, 6  ;;  %v259_v30 = vrot.slane %v974_v23, 6  ;;  %v276_v31 = vrot.slane %v972_v22, 5  ;;  %v277_v32 = vrot.slane %v974_v23, 5 }
  0x66   : > { %v234_v33 = vmul.f32 1.442695, %v232_v25  ;;  %v236_v34 = vmul.f32 1.442695, %v233_v26  ;;  %v244_v35 = vsub.f32 %v956_v2, %v240_v27  ;;  %v245_v36 = vsub.f32 %v958_v3, %v241_v28 }
  0x67   : > { %v262_v37 = vsub.f32 %v956_v2, %v258_v29  ;;  %v263_v38 = vsub.f32 %v958_v3, %v259_v30  ;;  %v280_v39 = vsub.f32 %v956_v2, %v276_v31  ;;  %v281_v40 = vsub.f32 %v958_v3, %v277_v32 }
  0x68   : > { %652 = vpow2.f32 %v234_v33  ;;  %v246_v41 = vmul.f32 1.442695, %v244_v35  ;;  %v248_v42 = vmul.f32 1.442695, %v245_v36  ;;  %v294_v43 = vrot.slane %v972_v22, 4 }
  0x69   : > { %654 = vpow2.f32 %v236_v34  ;;  %v264_v44 = vmul.f32 1.442695, %v262_v37  ;;  %v266_v45 = vmul.f32 1.442695, %v263_v38  ;;  %v282_v48 = vmul.f32 1.442695, %v280_v39 }
  0x6a   : > { %656 = vpow2.f32 %v246_v41  ;;  %v295_v49 = vrot.slane %v974_v23, 4  ;;  %v298_v50 = vsub.f32 %v956_v2, %v294_v43  ;;  %v284_v51 = vmul.f32 1.442695, %v281_v40 }
  0x6b   : > { %658 = vpow2.f32 %v248_v42  ;;  %v312_v52 = vrot.slane %v972_v22, 3  ;;  %v313_v53 = vrot.slane %v974_v23, 3  ;;  %v351_v25 = vrot.slane %v344_v6, %v1006_v0 }
  0x6c   : > { %660 = vpow2.f32 %v264_v44  ;;  %v299_v54 = vsub.f32 %v958_v3, %v295_v49  ;;  %v300_v55 = vmul.f32 1.442695, %v298_v50  ;;  %v363_v35 = vrot.slane %v356_v18, %v1006_v0  ;;  %v421_v18 = vld [vmem:[#allocation2] sm:$0x3] }
  0x6d   : > { %662 = vpow2.f32 %v266_v45  ;;  %v316_v56 = vsub.f32 %v956_v2, %v312_v52  ;;  %v317_v57 = vsub.f32 %v958_v3, %v313_v53  ;;  %v378_v36 = vcombine.high %v956_v2, %v958_v3 }
  0x6e   : > { %664 = vpow2.f32 %v282_v48  ;;  %v302_v58 = vmul.f32 1.442695, %v299_v54  ;;  %v353_v40 = vsel %vm336_vm1, %v351_v25, 0.0  ;;  %v808_v44 = vmov 0.0  }
  0x6f   : > { %666 = vpow2.f32 %v284_v51  ;;  %v318_v60 = vmul.f32 1.442695, %v316_v56  ;;  %v320_v61 = vmul.f32 1.442695, %v317_v57  ;;  %v354_v45 = vsel %vm336_vm1, 0.01988008, %v808_v44 }
  0x70   : > { %668 = vpow2.f32 %v300_v55  ;;  %v368_v46 = vcombine.high %v351_v25, %v351_v25  ;;  %v365_v48 = vsel %vm355_vm2, %v363_v35, %v353_v40  ;;  %v385_v49 = vrot.slane %v378_v36, %v1006_v0 }
  0x71   : > { %670 = vpow2.f32 %v302_v58  ;;  %v366_v2 = vsel %vm355_vm2, 4.065103, %v354_v45  ;;  %v373_v3 = vcombine.high %v363_v35, %v363_v35 }
  0x72   : > { %672 = vpow2.f32 %v318_v60  ;;  %v370_v50 = vsel %vm367_vm3, %v368_v46, %v365_v48  ;;  %v397_v51 = vcombine.high %v385_v49, %v385_v49  ;;  %v371_v52 = vsel %vm367_vm3, 0.01988008, %v366_v2 }
  0x73   : > { %674 = vpow2.f32 %v320_v61  ;;  %v392_v53 = vrot.slane %v385_v49, %v1006_v0  ;;  %v375_v54 = vsel %vm372_vm4, %v373_v3, %v370_v50  ;;  %v376_v55 = vsel %vm372_vm4, 0.38680777, %v371_v52 }
  0x74   : > { %v404_v56 = vrot.slane %v397_v51, %v1006_v0  ;;  %v395_v58 = vsel %vm377_vm5, 0.04662644, %v376_v55  ;;  %v411_v60 = vsub.s32 0, %v1001_v59 }
  0x75   : > { %v653_v1 = vpop.eup %652  ;;  %v394_v57 = vsel %vm377_vm5, %v392_v53, %v375_v54 }
  0x76   : > { %v655_v4 = vpop.eup %654  ;;  %v406_v61 = vsel %vm396_vm6, %v404_v56, %v394_v57 }
  0x77   : > { %v657_v5 = vpop.eup %656  ;;  %v412_v6 = vrot.slane %v406_v61, %v411_v60 }
  0x78   : > { %v659_v7 = vpop.eup %658  ;;  %v252_v8 = vrot.slane %v657_v5, 1 }
  0x79   : > { %v661_v9 = vpop.eup %660  ;;  %v253_v10 = vrot.slane %v659_v7, 1 }
  0x7a   : > { %v663_v11 = vpop.eup %662  ;;  %v256_v13 = vadd.f32 %v653_v1, %v252_v8  ;;  %v270_v14 = vrot.slane %v661_v9, 2  ;;  %v407_v1 = vsel %vm396_vm6, 0.48158285, %v395_v58  ;;  %v416_v8 = vrot.slane %v406_v61, %v415_v62 }
  0x7b   : > { %v665_v15 = vpop.eup %664  ;;  %v257_v16 = vadd.f32 %v655_v4, %v253_v10  ;;  %v271_v17 = vrot.slane %v663_v11, 2  ;;  %v426_v10 = vrot.slane %v407_v1, %v411_v60 }
  0x7c   : > { %v667_v19 = vpop.eup %666  ;;  %v274_v20 = vadd.f32 %v270_v14, %v256_v13  ;;  %v288_v21 = vrot.slane %v665_v15, 3  ;;  %v430_v13 = vrot.slane %v407_v1, %v415_v62 }
  0x7d   : > { %v669_v26 = vpop.eup %668  ;;  %v275_v27 = vadd.f32 %v271_v17, %v257_v16  ;;  %v289_v28 = vrot.slane %v667_v19, 3 }
  0x7e   : > { %v671_v29 = vpop.eup %670  ;;  %v292_v30 = vadd.f32 %v288_v21, %v274_v20  ;;  %v306_v31 = vrot.slane %v669_v26, 4 }
  0x7f   : > { %v673_v32 = vpop.eup %672  ;;  %v293_v33 = vadd.f32 %v289_v28, %v275_v27  ;;  %v307_v34 = vrot.slane %v671_v29, 4 }
  0x80   : > { %v675_v37 = vpop.eup %674  ;;  %v310_v38 = vadd.f32 %v306_v31, %v292_v30  ;;  %v324_v39 = vrot.slane %v673_v32, 5 }
  0x81   : > { %v311_v41 = vadd.f32 %v307_v34, %v293_v33  ;;  %v325_v42 = vrot.slane %v675_v37, 5 }
  0x82   : > { %v328_v43 = vadd.f32 %v324_v39, %v310_v38 }
  0x83   : > { %v329_v47 = vadd.f32 %v325_v42, %v311_v41 }
  0x84   : > { %676 = vlog2.f32 %v328_v43 }
  0x85   : > { %678 = vlog2.f32 %v329_v47 }
  0x91   : > { %v677_v63 = vpop.eup %676 }
  0x92   : > { %v679_v4 = vpop.eup %678  ;;  %v331_v5 = vmul.f32 0.6931472, %v677_v63 }
  0x93   : > { %v333_v7 = vmul.f32 0.6931472, %v679_v4 }
  0x94   : > { %v334_v9 = vadd.f32 %v331_v5, %v972_v22 }
  0x95   : > { %v335_v11 = vadd.f32 %v333_v7, %v974_v23 }
  0x96   : > { %v419_v12 = vsub.f32 %v334_v9, %v412_v6 }
  0x97   : > { %v420_v14 = vsub.f32 %v335_v11, %v416_v8 }
  0x98   : > { %v433_v15 = vmul.f32 %v426_v10, %v419_v12 }
  0x99   : > { %v434_v16 = vmul.f32 %v430_v13, %v420_v14 }
  0x9b   : > { %v437_v17 = vcombine.low %v433_v15, %v434_v16 }
  0x9d   : > { %v444_v59 = vrot.slane %v437_v17, %v1006_v0 }
  0x9f   : > { %v451_v19 = vrot.slane %v444_v59, %v1006_v0  ;;  %462 = sbr.rel (%p587_p8) target bundleno = 380 (0x17c), region = 44 }
  0xa1   : > { %v453_v20 = vadd.f32 %v451_v19, %v421_v18 }
  0xa3   : > { %458 = vst.msk [vmem:[#allocation2] sm:$0x3] %vm456_vm7, %v453_v20 }
  0xa4   : > { %vm475_vm8 = vcmask 1040384   ;;  %vm492_vm9 = vcmask 0  }
  0xaa   : > { %v463_v22 = vld [vmem:[#allocation2] sm:$0x3] }
  0xab   : > { %v468_v23 = vrot.slane %v463_v22, %v411_v60  ;;  %v472_v21 = vrot.slane %v463_v22, %v415_v62 }
  0xad   : > { %v476_v25 = vsel %vm475_vm8, %v468_v23, 0.0  ;;  %v477_v26 = vsel %vm475_vm8, %v472_v21, 0.0 }
  0xae   : > { %v478_v27 = vadd.f32 %v477_v26, %v476_v25 }
  0xb0   : > { %479 = vadd.xlane.f32.xlu0 %v478_v27 }
 0x139   : > { %v480_v28 = vpop.xlane.xlu0 %479 }
 0x13a   : > { %v481_v29 = vrot.slane %v480_v28, 4 }
 0x13c   : > { %v482_v30 = vadd.f32 %v481_v29, %v480_v28 }
 0x13e   : > { %v483_v31 = vrot.slane %v482_v30, 2 }
 0x140   : > { %v484_v0 = vadd.f32 %v483_v31, %v482_v30 }
 0x142   : > { %v485_v32 = vrot.slane %v484_v0, 1 }
 0x144   : > { %v486_v24 = vadd.f32 %v485_v32, %v484_v0 }
 0x146   : > { %594 = vpush %v486_v24 }
 0x177   : > { %s595_s18 = spop %594 }
 0x178   : > { %s490_s16 = smul.f32 0.0014285714, %s595_s18 }
 0x17a   : > { %v491_v33 = vstv %s490_s16 }
 0x17b   : > { %493 = vst.msk [vmem:[#allocation8] sm:$0x1] %vm492_vm9, %v491_v33 }
 0x17c PF: > { %p612_p3 = scmp.eq.s32.totalorder %s844_s13, 2  ;;  %s809_s25 = smov [#allocation8]  }
 0x17d   : > { %s501_s29 = sshll.u32 %s809_s25, 4  ;;  %s502_s29 = int_to_ptr.vmem [resolvable:$true] %s501_s29 }
 0x17e   : > { %s736_s30 = scalar_lea.vmem %s502_s29, 16  ;;  %s742_s24 = scalar_lea.vmem %s502_s29, 32 }
 0x17f   : > { %p737_p5 = scmp.ne.s32.totalorder %s502_s29, %s736_s30  ;;  %p743_p13 = scmp.lt.s32.totalorder %s502_s29, %s502_s29 }
 0x180   : > { %p744_p1 = scmp.lt.s32.totalorder %s742_s24, %s736_s30 }
 0x181   : > { %p738_p6 = pnand %p737_p5, %p612_p3 }
 0x182   : > { %p745_p0 = por %p744_p1, %p743_p13 }
 0x183   : > { %p739_p11 = pneg %p738_p6 }
 0x185   : > { %p746_p2 = pnand %p745_p0, %p739_p11 }
 0x187   : > { %749 = shalt.err (!%p746_p2)
}
 0x188   : > { %601 = dma.vmem_to_hbm [thread:$0]  (%p612_p3), %s502_s29, 16, %s1054_s2, [#allocation5]  }
 0x189   : > { %785 = dma.done.wait (%p612_p3), [#allocation5], 16  }
 0x18a   : > { %787 = vsyncadd (%p612_p3), [#allocation5], 4294967280 }
 0x18b PF: > { %p16_p9 = scmp.ge.s32.totalorder %s847_s14, 5   ;;  %s1063_s9 = smov %s794_s10 }
 0x18c   : > { %s1064_s10 = smov %s798_s11  ;;  %s1065_s11 = smov %s857_s17 }
 0x18d   : > { %s1066_s12 = smov %s847_s14  ;;  %18 = sbr.rel (!%p16_p9) target bundleno = 6 (0x6), region = 86 }
 0x192   :  { %514 = vsyncpa [#allocation4], 1 }
 0x193   :  { %516 = vsyncpa [#allocation4 + $0x1], 1 }
 0x194   :  { %517 = vsyncpa [#allocation7], 1 }
 0x195   :  { %519 = vsyncpa [#allocation7 + $0x1], 1 }
 0x196   :  { %520 = vsyncpa [#allocation5], 1 }
 0x197   :  { %522 = vsyncpa [#allocation5 + $0x1], 1 }

</bundles_post_ra>
